<compile_context>
chip_gen: v7x
topology: tpu7x:2x2x1
jax: 0.10.0
libtpu: 0.0.40
codegen_flags: <defaults>
</compile_context>

<pallas_src>
import functools

import numpy as np

import jax
import jax.numpy as jnp
from jax import lax
from jax.experimental import pallas as pl
from jax.experimental.pallas import tpu as pltpu


_LN_EPS = 1e-5  # torch.nn.LayerNorm default eps


def _layernorm(h, gamma, beta):
    # h: (tb, d); gamma/beta: (1, d)
    mean = jnp.mean(h, axis=-1, keepdims=True)
    c = h - mean
    var = jnp.mean(c * c, axis=-1, keepdims=True)
    return c * lax.rsqrt(var + _LN_EPS) * gamma + beta


def trompt_embedding_kernel(x_ref, idx_ref, w_ref, b_ref, tab_ref,
                            g1_ref, b1_ref, g2_ref, b2_ref, o_ref, *, n_num):
    n_cat = idx_ref.shape[1]
    V = tab_ref.shape[0]

    g1, be1 = g1_ref[...], b1_ref[...]          # (1, d)
    g2, be2 = g2_ref[...], b2_ref[...]          # (1, d)

    # ---- numerical branch: laynorm1(relu(x[..., None] * W + B)) ----
    x = x_ref[...]                              # (tb, n_num)
    w = w_ref[...]                              # (n_num, d)
    b = b_ref[...]                              # (n_num, d)
    for j in range(n_num):
        h = x[:, j:j + 1] * w[j:j + 1, :] + b[j:j + 1, :]      # (tb, d)
        h = jnp.maximum(h, 0.0)
        o_ref[:, j, :] = _layernorm(h, g1, be1).astype(o_ref.dtype)

    # ---- categorical branch: laynorm2(embedding row gather) ----
    # Gather done in-kernel as a one-hot matmul against the VMEM-resident
    # flattened table: rides the otherwise idle MXU, never touches HBM.
    idx = idx_ref[...]                          # (tb, n_cat) int32, pre-offset
    tab = tab_ref[...]                          # (V, d)
    iota_v = lax.broadcasted_iota(jnp.int32, (1, V), 1)
    for c in range(n_cat):
        onehot = (idx[:, c:c + 1] == iota_v).astype(jnp.float32)   # (tb, V)
        e = jnp.dot(onehot, tab, preferred_element_type=jnp.float32)  # (tb, d)
        o_ref[:, n_num + c, :] = _layernorm(e, g2, be2).astype(o_ref.dtype)


def _round_up(x, m):
    return (x + m - 1) // m * m


def _choose_tb(B, n_num, n_cat, d, *, tb_max=512, vmem_block_budget=8 << 20):
    """Batch tile: multiple of 8, sized from a VMEM budget, >=2 grid steps."""
    n_tot = n_num + n_cat
    # double-buffered batch-tiled blocks: x(f32) + idx(i32) + fused output(f32)
    bytes_per_row = 2 * 4 * (n_num + n_cat + n_tot * d)
    tb = vmem_block_budget // max(bytes_per_row, 1)
    tb = max(8, min(tb_max, (tb // 8) * 8))
    if B > 8:
        # keep at least 2 grid steps so "parallel" can shard across TensorCores
        tb = min(tb, _round_up(pl.cdiv(B, 2), 8))
    return max(tb, 8)


def trompt_embedding(x_num, x_cat, w_num, b_num, cat_tables,
                     ln1_w, ln1_b, ln2_w, ln2_b, *, tb_max=512):
    """Fused TromptEmbedding forward. Returns (B, n_num + n_cat, d) float32."""
    B, n_num = x_num.shape
    d = w_num.shape[-1]
    n_cat = x_cat.shape[1]
    n_tot = n_num + n_cat

    # Flattened categorical tables + per-feature row offsets (VMEM-resident).
    # TODO(synk): for very large vocabularies (flat table >> VMEM) fall back to
    # an XLA gather feeding an e_cat-consuming kernel variant.
    sizes = [int(t.shape[0]) for t in cat_tables]
    offsets = np.concatenate([[0], np.cumsum(sizes)[:-1]]).astype(np.int32)
    flat_table = jnp.concatenate([t.astype(jnp.float32) for t in cat_tables], 0)
    V = flat_table.shape[0]

    idx = x_cat.astype(jnp.int32) + jnp.asarray(offsets)[None, :]   # (B, n_cat)

    tb = _choose_tb(B, n_num, n_cat, d, tb_max=tb_max)
    n_tiles = pl.cdiv(B, tb)
    Bp = n_tiles * tb

    x2 = x_num.astype(jnp.float32)
    if Bp != B:  # only the tiny 2D inputs are ever padded
        pad = Bp - B
        x2 = jnp.pad(x2, ((0, pad), (0, 0)))
        idx = jnp.pad(idx, ((0, pad), (0, 0)))

    w2 = w_num.astype(jnp.float32)
    b2 = b_num.astype(jnp.float32)
    g1 = ln1_w.reshape(1, d).astype(jnp.float32)
    be1 = ln1_b.reshape(1, d).astype(jnp.float32)
    g2 = ln2_w.reshape(1, d).astype(jnp.float32)
    be2 = ln2_b.reshape(1, d).astype(jnp.float32)

    def batch2d(shape):       # tiled along batch axis
        return pl.BlockSpec(shape, lambda i: (i, 0))

    def resident(shape):      # constant index_map -> stays VMEM-resident
        return pl.BlockSpec(shape, lambda i: (0,) * len(shape))

    # Ragged last output block (OOB rows dropped) when B >= tb; for a single
    # partial tile, fall back to a padded output + slice (tiny B only).
    out_rows = B if B >= tb else Bp

    kernel = functools.partial(trompt_embedding_kernel, n_num=n_num)

    out = pl.pallas_call(
        kernel,
        out_shape=jax.ShapeDtypeStruct((out_rows, n_tot, d), jnp.float32),
        grid=(n_tiles,),
        in_specs=[
            batch2d((tb, n_num)),     # x_num (2D, broadcast in-kernel)
            batch2d((tb, n_cat)),     # offset-adjusted categorical indices
            resident((n_num, d)),     # LinearEmbeddings.weight
            resident((n_num, d)),     # LinearEmbeddings.bias
            resident((V, d)),         # flattened nn.Embedding tables
            resident((1, d)),         # laynorm1.weight
            resident((1, d)),         # laynorm1.bias
            resident((1, d)),         # laynorm2.weight
            resident((1, d)),         # laynorm2.bias
        ],
        out_specs=pl.BlockSpec((tb, n_tot, d), lambda i: (i, 0, 0)),
        compiler_params=pltpu.CompilerParams(
            dimension_semantics=("parallel",),
            vmem_limit_bytes=32 * 1024 * 1024),
    )(x2, idx, w2, b2, flat_table, g1, be1, g2, be2)

    return out if out_rows == B else out[:B]


def reference(x_num, x_cat, w_num, b_num, cat_tables, ln1_w, ln1_b, ln2_w, ln2_b):
    def ln(h, w, b):
        mean = h.mean(-1, keepdims=True)
        var = ((h - mean) ** 2).mean(-1, keepdims=True)
        return (h - mean) / jnp.sqrt(var + _LN_EPS) * w + b

    y_num = ln(jax.nn.relu(x_num[..., None] * w_num + b_num), ln1_w, ln1_b)
    embs = jnp.stack([cat_tables[i][x_cat[:, i]] for i in range(x_cat.shape[1])],
                     axis=1)
    y_cat = ln(embs, ln2_w, ln2_b)
    return jnp.concatenate([y_num, y_cat], axis=1)


if __name__ == "__main__":
    B, n_num, d = 10, 3, 128
    cat_cardinalities = [4, 7]
    n_cat = len(cat_cardinalities)

    key = jax.random.PRNGKey(0)
    ks = jax.random.split(key, 12)

    x_num = jax.random.normal(ks[0], (B, n_num), jnp.float32)
    x_cat = jnp.stack(
        [jax.random.randint(ks[1 + i], (B,), 0, c + 1)
         for i, c in enumerate(cat_cardinalities)], axis=1).astype(jnp.int32)

    s = 1.0 / (d ** 0.5)
    w_num = jax.random.uniform(ks[4], (n_num, d), jnp.float32, -s, s)
    b_num = jax.random.uniform(ks[5], (n_num, d), jnp.float32, -s, s)
    # Table values quantized to bf16-representable numbers so the in-kernel
    # one-hot MXU gather is bit-exact regardless of which f32-matmul pass count
    # the compiler picks (the one-hot itself is exactly 0.0 / 1.0).
    cat_tables = [jax.random.uniform(ks[6 + i], (c + 1, d), jnp.float32, -s, s)
                  .astype(jnp.bfloat16).astype(jnp.float32)
                  for i, c in enumerate(cat_cardinalities)]
    ln1_w = jax.random.uniform(ks[8], (d,), jnp.float32, 0.5, 1.5)
    ln1_b = jax.random.uniform(ks[9], (d,), jnp.float32, -0.5, 0.5)
    ln2_w = jax.random.uniform(ks[10], (d,), jnp.float32, 0.5, 1.5)
    ln2_b = jax.random.uniform(ks[11], (d,), jnp.float32, -0.5, 0.5)

    out = trompt_embedding(x_num, x_cat, w_num, b_num, cat_tables,
                           ln1_w, ln1_b, ln2_w, ln2_b)
    out = jax.block_until_ready(out)

    ref = reference(x_num, x_cat, w_num, b_num, cat_tables,
                    ln1_w, ln1_b, ln2_w, ln2_b)
    assert out.shape == (B, n_num + n_cat, d)
    assert jnp.allclose(out, ref, atol=1e-4, rtol=1e-4), "mismatch vs JAX reference"

    print("KERNEL_OK")
</pallas_src>

<mosaic_0001>
module attributes {stable_mosaic.version = 11 : i64} {
  func.func @trompt_embedding_kernel(%arg0: i32, %arg1: memref<8x3xf32, #tpu.memory_space<vmem>>, %arg2: memref<8x2xi32, #tpu.memory_space<vmem>>, %arg3: memref<3x128xf32, #tpu.memory_space<vmem>>, %arg4: memref<3x128xf32, #tpu.memory_space<vmem>>, %arg5: memref<13x128xf32, #tpu.memory_space<vmem>>, %arg6: memref<1x128xf32, #tpu.memory_space<vmem>>, %arg7: memref<1x128xf32, #tpu.memory_space<vmem>>, %arg8: memref<1x128xf32, #tpu.memory_space<vmem>>, %arg9: memref<1x128xf32, #tpu.memory_space<vmem>>, %arg10: memref<8x5x128xf32, #tpu.memory_space<vmem>>) attributes {dimension_semantics = [#tpu.dimension_semantics<parallel>], iteration_bounds = array<i64: 2>, scalar_prefetch = 0 : i64, scratch_operands = 0 : i64, tpu.core_type = #tpu.core_type<tc>, window_params = [{transform_indices = @transform_0, window_bounds = array<i64: 8, 3>}, {transform_indices = @transform_1, window_bounds = array<i64: 8, 2>}, {pipeline_mode = #tpu.pipeline_mode<synchronous>, transform_indices = @transform_2, window_bounds = array<i64: 3, 128>}, {pipeline_mode = #tpu.pipeline_mode<synchronous>, transform_indices = @transform_3, window_bounds = array<i64: 3, 128>}, {pipeline_mode = #tpu.pipeline_mode<synchronous>, transform_indices = @transform_4, window_bounds = array<i64: 13, 128>}, {pipeline_mode = #tpu.pipeline_mode<synchronous>, transform_indices = @transform_5, window_bounds = array<i64: 1, 128>}, {pipeline_mode = #tpu.pipeline_mode<synchronous>, transform_indices = @transform_6, window_bounds = array<i64: 1, 128>}, {pipeline_mode = #tpu.pipeline_mode<synchronous>, transform_indices = @transform_7, window_bounds = array<i64: 1, 128>}, {pipeline_mode = #tpu.pipeline_mode<synchronous>, transform_indices = @transform_8, window_bounds = array<i64: 1, 128>}, {transform_indices = @transform_9, window_bounds = array<i64: 8, 5, 128>}]} {
    %c0 = arith.constant 0 : index
    %c0_0 = arith.constant 0 : index
    %0 = vector.load %arg6[%c0, %c0_0] : memref<1x128xf32, #tpu.memory_space<vmem>>, vector<1x128xf32>
    %c0_1 = arith.constant 0 : index
    %c0_2 = arith.constant 0 : index
    %1 = vector.load %arg7[%c0_1, %c0_2] : memref<1x128xf32, #tpu.memory_space<vmem>>, vector<1x128xf32>
    %c0_3 = arith.constant 0 : index
    %c0_4 = arith.constant 0 : index
    %2 = vector.load %arg8[%c0_3, %c0_4] : memref<1x128xf32, #tpu.memory_space<vmem>>, vector<1x128xf32>
    %c0_5 = arith.constant 0 : index
    %c0_6 = arith.constant 0 : index
    %3 = vector.load %arg9[%c0_5, %c0_6] : memref<1x128xf32, #tpu.memory_space<vmem>>, vector<1x128xf32>
    %c0_7 = arith.constant 0 : index
    %c0_8 = arith.constant 0 : index
    %4 = vector.load %arg1[%c0_7, %c0_8] : memref<8x3xf32, #tpu.memory_space<vmem>>, vector<8x3xf32>
    %c0_9 = arith.constant 0 : index
    %c0_10 = arith.constant 0 : index
    %5 = vector.load %arg3[%c0_9, %c0_10] : memref<3x128xf32, #tpu.memory_space<vmem>>, vector<3x128xf32>
    %c0_11 = arith.constant 0 : index
    %c0_12 = arith.constant 0 : index
    %6 = vector.load %arg4[%c0_11, %c0_12] : memref<3x128xf32, #tpu.memory_space<vmem>>, vector<3x128xf32>
    %7 = vector.extract_strided_slice %4 {offsets = [0, 0], sizes = [8, 1], strides = [1, 1]} : vector<8x3xf32> to vector<8x1xf32>
    %8 = vector.extract_strided_slice %5 {offsets = [0, 0], sizes = [1, 128], strides = [1, 1]} : vector<3x128xf32> to vector<1x128xf32>
    %9 = vector.broadcast %7 : vector<8x1xf32> to vector<8x128xf32>
    %10 = vector.broadcast %8 : vector<1x128xf32> to vector<8x128xf32>
    %11 = arith.mulf %9, %10 : vector<8x128xf32>
    %12 = vector.extract_strided_slice %6 {offsets = [0, 0], sizes = [1, 128], strides = [1, 1]} : vector<3x128xf32> to vector<1x128xf32>
    %13 = vector.broadcast %12 : vector<1x128xf32> to vector<8x128xf32>
    %14 = arith.addf %11, %13 : vector<8x128xf32>
    %cst = arith.constant 0.000000e+00 : f32
    %15 = vector.broadcast %cst : f32 to vector<8x128xf32>
    %16 = arith.maximumf %14, %15 : vector<8x128xf32>
    %cst_13 = arith.constant dense<0.000000e+00> : vector<8xf32>
    %17 = vector.multi_reduction <add>, %16, %cst_13 [1] : vector<8x128xf32> to vector<8xf32>
    %18 = vector.shape_cast %17 : vector<8xf32> to vector<8x1xf32>
    %cst_14 = arith.constant 1.280000e+02 : f32
    %19 = vector.broadcast %cst_14 : f32 to vector<8x1xf32>
    %20 = arith.divf %18, %19 : vector<8x1xf32>
    %21 = vector.broadcast %20 : vector<8x1xf32> to vector<8x128xf32>
    %22 = arith.subf %16, %21 : vector<8x128xf32>
    %23 = arith.mulf %22, %22 : vector<8x128xf32>
    %cst_15 = arith.constant dense<0.000000e+00> : vector<8xf32>
    %24 = vector.multi_reduction <add>, %23, %cst_15 [1] : vector<8x128xf32> to vector<8xf32>
    %25 = vector.shape_cast %24 : vector<8xf32> to vector<8x1xf32>
    %cst_16 = arith.constant 1.280000e+02 : f32
    %26 = vector.broadcast %cst_16 : f32 to vector<8x1xf32>
    %27 = arith.divf %25, %26 : vector<8x1xf32>
    %cst_17 = arith.constant 9.99999974E-6 : f32
    %28 = vector.broadcast %cst_17 : f32 to vector<8x1xf32>
    %29 = arith.addf %27, %28 : vector<8x1xf32>
    %30 = math.rsqrt %29 : vector<8x1xf32>
    %31 = vector.broadcast %30 : vector<8x1xf32> to vector<8x128xf32>
    %32 = arith.mulf %22, %31 : vector<8x128xf32>
    %33 = vector.broadcast %0 : vector<1x128xf32> to vector<8x128xf32>
    %34 = arith.mulf %32, %33 : vector<8x128xf32>
    %35 = vector.broadcast %1 : vector<1x128xf32> to vector<8x128xf32>
    %36 = arith.addf %34, %35 : vector<8x128xf32>
    %c0_18 = arith.constant 0 : index
    %c0_19 = arith.constant 0 : index
    %c0_20 = arith.constant 0 : index
    %37 = vector.load %arg10[%c0_18, %c0_19, %c0_20] : memref<8x5x128xf32, #tpu.memory_space<vmem>>, vector<8x1x128xf32>
    %38 = vector.shape_cast %37 : vector<8x1x128xf32> to vector<8x128xf32>
    %39 = vector.shape_cast %36 : vector<8x128xf32> to vector<8x1x128xf32>
    tpu.vector_store %arg10[%c0_18, %c0_19, %c0_20], %39 {strides = array<i32>} : memref<8x5x128xf32, #tpu.memory_space<vmem>>, vector<8x1x128xf32>,
    %40 = vector.extract_strided_slice %4 {offsets = [0, 1], sizes = [8, 1], strides = [1, 1]} : vector<8x3xf32> to vector<8x1xf32>
    %41 = vector.extract_strided_slice %5 {offsets = [1, 0], sizes = [1, 128], strides = [1, 1]} : vector<3x128xf32> to vector<1x128xf32>
    %42 = vector.broadcast %40 : vector<8x1xf32> to vector<8x128xf32>
    %43 = vector.broadcast %41 : vector<1x128xf32> to vector<8x128xf32>
    %44 = arith.mulf %42, %43 : vector<8x128xf32>
    %45 = vector.extract_strided_slice %6 {offsets = [1, 0], sizes = [1, 128], strides = [1, 1]} : vector<3x128xf32> to vector<1x128xf32>
    %46 = vector.broadcast %45 : vector<1x128xf32> to vector<8x128xf32>
    %47 = arith.addf %44, %46 : vector<8x128xf32>
    %cst_21 = arith.constant 0.000000e+00 : f32
    %48 = vector.broadcast %cst_21 : f32 to vector<8x128xf32>
    %49 = arith.maximumf %47, %48 : vector<8x128xf32>
    %cst_22 = arith.constant dense<0.000000e+00> : vector<8xf32>
    %50 = vector.multi_reduction <add>, %49, %cst_22 [1] : vector<8x128xf32> to vector<8xf32>
    %51 = vector.shape_cast %50 : vector<8xf32> to vector<8x1xf32>
    %cst_23 = arith.constant 1.280000e+02 : f32
    %52 = vector.broadcast %cst_23 : f32 to vector<8x1xf32>
    %53 = arith.divf %51, %52 : vector<8x1xf32>
    %54 = vector.broadcast %53 : vector<8x1xf32> to vector<8x128xf32>
    %55 = arith.subf %49, %54 : vector<8x128xf32>
    %56 = arith.mulf %55, %55 : vector<8x128xf32>
    %cst_24 = arith.constant dense<0.000000e+00> : vector<8xf32>
    %57 = vector.multi_reduction <add>, %56, %cst_24 [1] : vector<8x128xf32> to vector<8xf32>
    %58 = vector.shape_cast %57 : vector<8xf32> to vector<8x1xf32>
    %cst_25 = arith.constant 1.280000e+02 : f32
    %59 = vector.broadcast %cst_25 : f32 to vector<8x1xf32>
    %60 = arith.divf %58, %59 : vector<8x1xf32>
    %cst_26 = arith.constant 9.99999974E-6 : f32
    %61 = vector.broadcast %cst_26 : f32 to vector<8x1xf32>
    %62 = arith.addf %60, %61 : vector<8x1xf32>
    %63 = math.rsqrt %62 : vector<8x1xf32>
    %64 = vector.broadcast %63 : vector<8x1xf32> to vector<8x128xf32>
    %65 = arith.mulf %55, %64 : vector<8x128xf32>
    %66 = vector.broadcast %0 : vector<1x128xf32> to vector<8x128xf32>
    %67 = arith.mulf %65, %66 : vector<8x128xf32>
    %68 = vector.broadcast %1 : vector<1x128xf32> to vector<8x128xf32>
    %69 = arith.addf %67, %68 : vector<8x128xf32>
    %c0_27 = arith.constant 0 : index
    %c1 = arith.constant 1 : index
    %c0_28 = arith.constant 0 : index
    %70 = vector.load %arg10[%c0_27, %c1, %c0_28] : memref<8x5x128xf32, #tpu.memory_space<vmem>>, vector<8x1x128xf32>
    %71 = vector.shape_cast %70 : vector<8x1x128xf32> to vector<8x128xf32>
    %72 = vector.shape_cast %69 : vector<8x128xf32> to vector<8x1x128xf32>
    tpu.vector_store %arg10[%c0_27, %c1, %c0_28], %72 {strides = array<i32>} : memref<8x5x128xf32, #tpu.memory_space<vmem>>, vector<8x1x128xf32>,
    %73 = vector.extract_strided_slice %4 {offsets = [0, 2], sizes = [8, 1], strides = [1, 1]} : vector<8x3xf32> to vector<8x1xf32>
    %74 = vector.extract_strided_slice %5 {offsets = [2, 0], sizes = [1, 128], strides = [1, 1]} : vector<3x128xf32> to vector<1x128xf32>
    %75 = vector.broadcast %73 : vector<8x1xf32> to vector<8x128xf32>
    %76 = vector.broadcast %74 : vector<1x128xf32> to vector<8x128xf32>
    %77 = arith.mulf %75, %76 : vector<8x128xf32>
    %78 = vector.extract_strided_slice %6 {offsets = [2, 0], sizes = [1, 128], strides = [1, 1]} : vector<3x128xf32> to vector<1x128xf32>
    %79 = vector.broadcast %78 : vector<1x128xf32> to vector<8x128xf32>
    %80 = arith.addf %77, %79 : vector<8x128xf32>
    %cst_29 = arith.constant 0.000000e+00 : f32
    %81 = vector.broadcast %cst_29 : f32 to vector<8x128xf32>
    %82 = arith.maximumf %80, %81 : vector<8x128xf32>
    %cst_30 = arith.constant dense<0.000000e+00> : vector<8xf32>
    %83 = vector.multi_reduction <add>, %82, %cst_30 [1] : vector<8x128xf32> to vector<8xf32>
    %84 = vector.shape_cast %83 : vector<8xf32> to vector<8x1xf32>
    %cst_31 = arith.constant 1.280000e+02 : f32
    %85 = vector.broadcast %cst_31 : f32 to vector<8x1xf32>
    %86 = arith.divf %84, %85 : vector<8x1xf32>
    %87 = vector.broadcast %86 : vector<8x1xf32> to vector<8x128xf32>
    %88 = arith.subf %82, %87 : vector<8x128xf32>
    %89 = arith.mulf %88, %88 : vector<8x128xf32>
    %cst_32 = arith.constant dense<0.000000e+00> : vector<8xf32>
    %90 = vector.multi_reduction <add>, %89, %cst_32 [1] : vector<8x128xf32> to vector<8xf32>
    %91 = vector.shape_cast %90 : vector<8xf32> to vector<8x1xf32>
    %cst_33 = arith.constant 1.280000e+02 : f32
    %92 = vector.broadcast %cst_33 : f32 to vector<8x1xf32>
    %93 = arith.divf %91, %92 : vector<8x1xf32>
    %cst_34 = arith.constant 9.99999974E-6 : f32
    %94 = vector.broadcast %cst_34 : f32 to vector<8x1xf32>
    %95 = arith.addf %93, %94 : vector<8x1xf32>
    %96 = math.rsqrt %95 : vector<8x1xf32>
    %97 = vector.broadcast %96 : vector<8x1xf32> to vector<8x128xf32>
    %98 = arith.mulf %88, %97 : vector<8x128xf32>
    %99 = vector.broadcast %0 : vector<1x128xf32> to vector<8x128xf32>
    %100 = arith.mulf %98, %99 : vector<8x128xf32>
    %101 = vector.broadcast %1 : vector<1x128xf32> to vector<8x128xf32>
    %102 = arith.addf %100, %101 : vector<8x128xf32>
    %c0_35 = arith.constant 0 : index
    %c2 = arith.constant 2 : index
    %c0_36 = arith.constant 0 : index
    %103 = vector.load %arg10[%c0_35, %c2, %c0_36] : memref<8x5x128xf32, #tpu.memory_space<vmem>>, vector<8x1x128xf32>
    %104 = vector.shape_cast %103 : vector<8x1x128xf32> to vector<8x128xf32>
    %105 = vector.shape_cast %102 : vector<8x128xf32> to vector<8x1x128xf32>
    tpu.vector_store %arg10[%c0_35, %c2, %c0_36], %105 {strides = array<i32>} : memref<8x5x128xf32, #tpu.memory_space<vmem>>, vector<8x1x128xf32>,
    %c0_37 = arith.constant 0 : index
    %c0_38 = arith.constant 0 : index
    %106 = vector.load %arg2[%c0_37, %c0_38] : memref<8x2xi32, #tpu.memory_space<vmem>>, vector<8x2xi32>
    %c0_39 = arith.constant 0 : index
    %c0_40 = arith.constant 0 : index
    %107 = vector.load %arg5[%c0_39, %c0_40] : memref<13x128xf32, #tpu.memory_space<vmem>>, vector<13x128xf32>
    %108 = tpu.iota {dimensions = array<i32: 1>} : vector<1x13xi32>
    %109 = vector.extract_strided_slice %106 {offsets = [0, 0], sizes = [8, 1], strides = [1, 1]} : vector<8x2xi32> to vector<8x1xi32>
    %110 = vector.broadcast %109 : vector<8x1xi32> to vector<8x13xi32>
    %111 = vector.broadcast %108 : vector<1x13xi32> to vector<8x13xi32>
    %112 = arith.cmpi eq, %110, %111 : vector<8x13xi32>
    %113 = arith.extui %112 : vector<8x13xi1> to vector<8x13xi32>
    %114 = arith.sitofp %113 : vector<8x13xi32> to vector<8x13xf32>
    %cst_41 = arith.constant dense<0.000000e+00> : vector<8x128xf32>
    %115 = tpu.matmul %114, %107, %cst_41 {dimension_numbers = #tpu.dot_dimension_numbers<[1], [0], [0], [1], [0, 0, 1, 1], [], []>} : vector<8x13xf32>, vector<13x128xf32>, vector<8x128xf32> -> vector<8x128xf32>
    %cst_42 = arith.constant dense<0.000000e+00> : vector<8xf32>
    %116 = vector.multi_reduction <add>, %115, %cst_42 [1] : vector<8x128xf32> to vector<8xf32>
    %117 = vector.shape_cast %116 : vector<8xf32> to vector<8x1xf32>
    %cst_43 = arith.constant 1.280000e+02 : f32
    %118 = vector.broadcast %cst_43 : f32 to vector<8x1xf32>
    %119 = arith.divf %117, %118 : vector<8x1xf32>
    %120 = vector.broadcast %119 : vector<8x1xf32> to vector<8x128xf32>
    %121 = arith.subf %115, %120 : vector<8x128xf32>
    %122 = arith.mulf %121, %121 : vector<8x128xf32>
    %cst_44 = arith.constant dense<0.000000e+00> : vector<8xf32>
    %123 = vector.multi_reduction <add>, %122, %cst_44 [1] : vector<8x128xf32> to vector<8xf32>
    %124 = vector.shape_cast %123 : vector<8xf32> to vector<8x1xf32>
    %cst_45 = arith.constant 1.280000e+02 : f32
    %125 = vector.broadcast %cst_45 : f32 to vector<8x1xf32>
    %126 = arith.divf %124, %125 : vector<8x1xf32>
    %cst_46 = arith.constant 9.99999974E-6 : f32
    %127 = vector.broadcast %cst_46 : f32 to vector<8x1xf32>
    %128 = arith.addf %126, %127 : vector<8x1xf32>
    %129 = math.rsqrt %128 : vector<8x1xf32>
    %130 = vector.broadcast %129 : vector<8x1xf32> to vector<8x128xf32>
    %131 = arith.mulf %121, %130 : vector<8x128xf32>
    %132 = vector.broadcast %2 : vector<1x128xf32> to vector<8x128xf32>
    %133 = arith.mulf %131, %132 : vector<8x128xf32>
    %134 = vector.broadcast %3 : vector<1x128xf32> to vector<8x128xf32>
    %135 = arith.addf %133, %134 : vector<8x128xf32>
    %c0_47 = arith.constant 0 : index
    %c3 = arith.constant 3 : index
    %c0_48 = arith.constant 0 : index
    %136 = vector.load %arg10[%c0_47, %c3, %c0_48] : memref<8x5x128xf32, #tpu.memory_space<vmem>>, vector<8x1x128xf32>
    %137 = vector.shape_cast %136 : vector<8x1x128xf32> to vector<8x128xf32>
    %138 = vector.shape_cast %135 : vector<8x128xf32> to vector<8x1x128xf32>
    tpu.vector_store %arg10[%c0_47, %c3, %c0_48], %138 {strides = array<i32>} : memref<8x5x128xf32, #tpu.memory_space<vmem>>, vector<8x1x128xf32>,
    %139 = vector.extract_strided_slice %106 {offsets = [0, 1], sizes = [8, 1], strides = [1, 1]} : vector<8x2xi32> to vector<8x1xi32>
    %140 = vector.broadcast %139 : vector<8x1xi32> to vector<8x13xi32>
    %141 = vector.broadcast %108 : vector<1x13xi32> to vector<8x13xi32>
    %142 = arith.cmpi eq, %140, %141 : vector<8x13xi32>
    %143 = arith.extui %142 : vector<8x13xi1> to vector<8x13xi32>
    %144 = arith.sitofp %143 : vector<8x13xi32> to vector<8x13xf32>
    %cst_49 = arith.constant dense<0.000000e+00> : vector<8x128xf32>
    %145 = tpu.matmul %144, %107, %cst_49 {dimension_numbers = #tpu.dot_dimension_numbers<[1], [0], [0], [1], [0, 0, 1, 1], [], []>} : vector<8x13xf32>, vector<13x128xf32>, vector<8x128xf32> -> vector<8x128xf32>
    %cst_50 = arith.constant dense<0.000000e+00> : vector<8xf32>
    %146 = vector.multi_reduction <add>, %145, %cst_50 [1] : vector<8x128xf32> to vector<8xf32>
    %147 = vector.shape_cast %146 : vector<8xf32> to vector<8x1xf32>
    %cst_51 = arith.constant 1.280000e+02 : f32
    %148 = vector.broadcast %cst_51 : f32 to vector<8x1xf32>
    %149 = arith.divf %147, %148 : vector<8x1xf32>
    %150 = vector.broadcast %149 : vector<8x1xf32> to vector<8x128xf32>
    %151 = arith.subf %145, %150 : vector<8x128xf32>
    %152 = arith.mulf %151, %151 : vector<8x128xf32>
    %cst_52 = arith.constant dense<0.000000e+00> : vector<8xf32>
    %153 = vector.multi_reduction <add>, %152, %cst_52 [1] : vector<8x128xf32> to vector<8xf32>
    %154 = vector.shape_cast %153 : vector<8xf32> to vector<8x1xf32>
    %cst_53 = arith.constant 1.280000e+02 : f32
    %155 = vector.broadcast %cst_53 : f32 to vector<8x1xf32>
    %156 = arith.divf %154, %155 : vector<8x1xf32>
    %cst_54 = arith.constant 9.99999974E-6 : f32
    %157 = vector.broadcast %cst_54 : f32 to vector<8x1xf32>
    %158 = arith.addf %156, %157 : vector<8x1xf32>
    %159 = math.rsqrt %158 : vector<8x1xf32>
    %160 = vector.broadcast %159 : vector<8x1xf32> to vector<8x128xf32>
    %161 = arith.mulf %151, %160 : vector<8x128xf32>
    %162 = vector.broadcast %2 : vector<1x128xf32> to vector<8x128xf32>
    %163 = arith.mulf %161, %162 : vector<8x128xf32>
    %164 = vector.broadcast %3 : vector<1x128xf32> to vector<8x128xf32>
    %165 = arith.addf %163, %164 : vector<8x128xf32>
    %c0_55 = arith.constant 0 : index
    %c4 = arith.constant 4 : index
    %c0_56 = arith.constant 0 : index
    %166 = vector.load %arg10[%c0_55, %c4, %c0_56] : memref<8x5x128xf32, #tpu.memory_space<vmem>>, vector<8x1x128xf32>
    %167 = vector.shape_cast %166 : vector<8x1x128xf32> to vector<8x128xf32>
    %168 = vector.shape_cast %165 : vector<8x128xf32> to vector<8x1x128xf32>
    tpu.vector_store %arg10[%c0_55, %c4, %c0_56], %168 {strides = array<i32>} : memref<8x5x128xf32, #tpu.memory_space<vmem>>, vector<8x1x128xf32>,
    return
  }
  func.func @transform_0(%arg0: i32) -> (i32, i32) {
    %c0_i32 = arith.constant 0 : i32
    %c0_i32_0 = arith.constant 0 : i32
    return %arg0, %c0_i32 : i32, i32
  }
  func.func @transform_1(%arg0: i32) -> (i32, i32) {
    %c0_i32 = arith.constant 0 : i32
    %c0_i32_0 = arith.constant 0 : i32
    return %arg0, %c0_i32 : i32, i32
  }
  func.func @transform_2(%arg0: i32) -> (i32, i32) {
    %c0_i32 = arith.constant 0 : i32
    %c0_i32_0 = arith.constant 0 : i32
    %c0_i32_1 = arith.constant 0 : i32
    return %c0_i32, %c0_i32_0 : i32, i32
  }
  func.func @transform_3(%arg0: i32) -> (i32, i32) {
    %c0_i32 = arith.constant 0 : i32
    %c0_i32_0 = arith.constant 0 : i32
    %c0_i32_1 = arith.constant 0 : i32
    return %c0_i32, %c0_i32_0 : i32, i32
  }
  func.func @transform_4(%arg0: i32) -> (i32, i32) {
    %c0_i32 = arith.constant 0 : i32
    %c0_i32_0 = arith.constant 0 : i32
    %c0_i32_1 = arith.constant 0 : i32
    return %c0_i32, %c0_i32_0 : i32, i32
  }
  func.func @transform_5(%arg0: i32) -> (i32, i32) {
    %c0_i32 = arith.constant 0 : i32
    %c0_i32_0 = arith.constant 0 : i32
    %c0_i32_1 = arith.constant 0 : i32
    return %c0_i32, %c0_i32_0 : i32, i32
  }
  func.func @transform_6(%arg0: i32) -> (i32, i32) {
    %c0_i32 = arith.constant 0 : i32
    %c0_i32_0 = arith.constant 0 : i32
    %c0_i32_1 = arith.constant 0 : i32
    return %c0_i32, %c0_i32_0 : i32, i32
  }
  func.func @transform_7(%arg0: i32) -> (i32, i32) {
    %c0_i32 = arith.constant 0 : i32
    %c0_i32_0 = arith.constant 0 : i32
    %c0_i32_1 = arith.constant 0 : i32
    return %c0_i32, %c0_i32_0 : i32, i32
  }
  func.func @transform_8(%arg0: i32) -> (i32, i32) {
    %c0_i32 = arith.constant 0 : i32
    %c0_i32_0 = arith.constant 0 : i32
    %c0_i32_1 = arith.constant 0 : i32
    return %c0_i32, %c0_i32_0 : i32, i32
  }
  func.func @transform_9(%arg0: i32) -> (i32, i32, i32) {
    %c0_i32 = arith.constant 0 : i32
    %c0_i32_0 = arith.constant 0 : i32
    %c0_i32_1 = arith.constant 0 : i32
    return %arg0, %c0_i32, %c0_i32_0 : i32, i32, i32
  }
}

</mosaic_0001>

<bundles_post_ra>
// kernel: tpu_custom_call.1
= control target key start
LH: loop header
LB: loop body
LE: loop exit
PB: predicated region body
PF: predicated region fallthrough
CT: control target
= control target key end

     0   :  { %14 = vsyncpa [#allocation3], 0  ;;  %s1586_s0 = inlined_call_operand.vmem [shape: f32[16,3], index: 0, kind: input, shape index: {}]   ;;  %s1587_s1 = inlined_call_operand.vmem [shape: s32[16,2], index: 1, kind: input, shape index: {}]   ;;  %s1588_s2 = inlined_call_operand.vmem [shape: f32[3,128], index: 2, kind: input, shape index: {}]   ;;  %s1589_s3 = inlined_call_operand.vmem [shape: f32[3,128], index: 3, kind: input, shape index: {}]   ;;  %s1590_s4 = inlined_call_operand.vmem [shape: f32[13,128], index: 4, kind: input, shape index: {}]   ;;  %s1591_s5 = inlined_call_operand.vmem [shape: f32[1,128], index: 5, kind: input, shape index: {}]   ;;  %s1592_s6 = inlined_call_operand.vmem [shape: f32[1,128], index: 6, kind: input, shape index: {}]   ;;  %s1593_s7 = inlined_call_operand.vmem [shape: f32[1,128], index: 7, kind: input, shape index: {}]   ;;  %s1594_s8 = inlined_call_operand.vmem [shape: f32[1,128], index: 8, kind: input, shape index: {}]   ;;  %s1595_s9 = inlined_call_operand.hbm [shape: f32[10,5,128], index: 9, kind: output, shape index: {}]  }
   0x1   :  { %16 = vsyncpa [#allocation3 + $0x1], 0  ;;  %s1348_s30 = smov 0   ;;  %s1350_s10 = smov 0  }
   0x2   :  { %s1352_s11 = smov 0   ;;  %s1354_s12 = smov 0  }
   0x3 LB: > { %s1369_s13 = sadd.s32 4294967295, %s1285_s12   ;;  %s1085_s14 = sadd.s32 4294967294, %s1285_s12   ;;  %s1285_s12 = sphi %s1354_s12, %s1601_s12   ;;  %s1281_s11 = sphi %s1352_s11, %s1600_s11   ;;  %s1277_s10 = sphi %s1350_s10, %s1599_s10   ;;  %s1273_s30 = sphi %s1348_s30, %s1598_s30  }
   0x4   : > { %s1373_s15 = sadd.s32 1, %s1285_s12   ;;  %s228_s16 = sadd.s32 1, %s1281_s11 }
   0x5   : > { %s225_s17 = ssub.s32 %s1285_s12, %s1373_s15  ;;  %p238_p0 = scmp.ne.s32.totalorder %s1281_s11, %s1277_s10 }
   0x6   : > { %p226_p1 = scmp.eq.s32.totalorder %s225_s17, 0  ;;  %p239_p2 = scmp.eq.s32.totalorder %s1369_s13, 1 }
   0x7   : > { %p244_p3 = scmp.ne.s32.totalorder %s1277_s10, %s1273_s30  ;;  %p245_p4 = scmp.eq.s32.totalorder %s1085_s14, 1 }
   0x8   : > { %s1384_s18 = scalar_select %p226_p1, %s1281_s11, %s228_s16  }
   0x9   : > { %p1386_p5 = por %p239_p2, %p238_p0  ;;  %p1390_p6 = por %p245_p4, %p244_p3 }
   0xa   : > { %p1088_p7 = scmp.ge.s32.totalorder %s1285_s12, 1  ;;  %p298_p8 = scmp.lt.s32.totalorder %s1285_s12, 3 }
   0xc   : > { %p299_p9 = pnand %p1088_p7, %p298_p8 }
   0xd   : > { %p337_p10 = scmp.lt.s32.totalorder (!%p299_p9), %s1369_s13, 1  ;;  %v654_v0 = vld [vmem:[%s1590_s4] sm:$0xff] (!%p299_p9)  ;;  %v1287_v1 = vmov (!%p299_p9), 0   ;;  %v655_v2 = vld [vmem:[%s1590_s4 + $0x8] sm:$0x1f] (!%p299_p9)  ;;  %vm668_vm0 = vcmask (!%p299_p9), 1044480   ;;  %v362_v10 = vlaneseq (!%p299_p9) }
   0xe   : > { %302 = sbr.rel (%p299_p9) target bundleno = 723 (0x2d3), region = 56  ;;  %1208 = vset.pattern.permute.xlu0 (!%p299_p9), %v1287_v1  ;;  %1210 = vset.pattern.permute.xlu1 (!%p299_p9), %v1287_v1  ;;  %v1288_v3 = vmov (!%p299_p9), 0.0|0.0   ;;  %v1153_v4 = vpack.c.bf16 (!%p299_p9), %v655_v2, %v654_v0  ;;  %vm1289_vm1 = vmmov (!%p299_p9), 1   ;;  %vm1290_vm3 = vmmov (!%p299_p9), 0   ;;  %v355_v13 = vld [vmem:[%s1588_s2] sm:$0x7] (!%p299_p9) }
   0xf   : > { %1152 = vmatprep.subr.bf16.mxu0 (!%p299_p9), %v1288_v3  ;;  %vm1154_vm2 = vmpackc.low (!%p299_p9), %vm668_vm0, %vm1289_vm1  ;;  %1156 = vmatprep.subr.bf16.mxu1 (!%p299_p9), %v1288_v3  ;;  %v1291_v7 = vmov (!%p299_p9), 0.0   ;;  %v1292_v8 = vmov (!%p299_p9), 1   ;;  %v1293_v9 = vmov (!%p299_p9), 2   ;;  %v1410_v11 = vshrl.u32 (!%p299_p9), %v362_v10, 7  ;;  %v356_v14 = vld [vmem:[%s1589_s3] sm:$0x7] (!%p299_p9) }
  0x10   : > { %1155 = vmatpush3.bf16.msk.msra.mxu0 (!%p299_p9), %vm1154_vm2, %v1153_v4  ;;  %1159 = vmatpush3.bf16.msk.msra.mxu1 (!%p299_p9), %vm1154_vm2, %v1153_v4  ;;  %v657_v15 = vand.u32 (!%p299_p9), 127, %v362_v10  ;;  %vm664_vm4 = vcmask (!%p299_p9), 105472  }
  0x11   : > { %1142 = vmatprep.mubr.msk.f32.mxu0 (!%p299_p9), %vm1290_vm3, %v1291_v7  ;;  %1149 = vmatprep.mubr.msk.f32.mxu1 (!%p299_p9), %vm1290_vm3, %v1291_v7  ;;  %v364_v12 = vsub.s32 (!%p299_p9), 0, %v1410_v11  ;;  %v471_v17 = vsub.s32 (!%p299_p9), 1, %v1410_v11  ;;  %v565_v25 = vsub.s32 (!%p299_p9), 2, %v1410_v11 }
  0x13   : > { %v365_v16 = vrot.slane (!%p299_p9), %v355_v13, %v364_v12  ;;  %v370_v18 = vrot.slane (!%p299_p9), %v356_v14, %v364_v12  ;;  %v472_v23 = vrot.slane (!%p299_p9), %v355_v13, %v471_v17  ;;  %v477_v26 = vrot.slane (!%p299_p9), %v356_v14, %v471_v17 }
  0x14   : > { %v566_v32 = vrot.slane (!%p299_p9), %v355_v13, %v565_v25  ;;  %v571_v34 = vrot.slane (!%p299_p9), %v356_v14, %v565_v25  ;;  %v1092_v14 = vld [vmem:[%s1591_s5] ss:$0 sm:$0xff] (!%p299_p9) }
  0x15   : > { %s338_s25 = scalar_select %p337_p10, %s1369_s13, 1 }
  0x17   : > { %s1090_s26 = sshll.u32 %s338_s25, 3  ;;  %s334_s25 = sand.u32 1, %s1277_s10  }
  0x18   : > { %s344_s29 = scalar_lea.vmem %s1587_s1, %s1090_s26  ;;  %s340_s17 = scalar_lea.vmem %s1586_s0, %s1090_s26 }
  0x19   : > { %v653_v5 = vld [vmem:[%s344_s29] sm:$0xff]  ;;  %s1089_s14 = sshll.u32 %s334_s25, 6  ;;  %s1525_s24 = scalar_lea.sflag [#allocation3], %s334_s25 }
  0x1a   : > { %v354_v6 = vld [vmem:[%s340_s17] sm:$0xff]  ;;  %659 = vperm.xlu0 %1208, %v653_v5   ;;  %s1446_s16 = scalar_lea.vmem [#allocation2], %s1089_s14  ;;  %s1123_s26 = sshll.u32 (%p1386_p5), %s1369_s13, 3 }
  0x1b   : > { %359 = vperm.xlu1 %1210, %v354_v6   ;;  %s1000_s27 = ssub.s32 (%p1386_p5), 10, %s1123_s26 }
  0x1c   : > { %p1001_p11 = scmp.lt.s32.totalorder (%p1386_p5), %s1000_s27, 8 }
  0x1e   : > { %1209 = vset.pattern.permute.xlu0 %v1292_v8 }
  0x1f   : > { %1211 = vset.pattern.permute.xlu1 %v1292_v8  ;;  %834 = vperm.xlu0 %1209, %v653_v5  }
  0x20   : > { %466 = vperm.xlu1 %1211, %v354_v6  }
  0x24   : > { %1212 = vset.pattern.permute.xlu1 %v1293_v9  ;;  %v1294_v9 = vmov 1966171168  }
  0x25   : > { %560 = vperm.xlu1 %1212, %v354_v6   ;;  %v402_v10 = vunpack.c.l.s4 %v1294_v9 }
  0x27   : > { %v403_v12 = vunpack.c.0.s8 %v402_v10 }
  0x29   : > { %v1439_v17 = vsub.s32 %v403_v12, %v1410_v11  ;;  %v1109_v12 = vld [vmem:[%s1593_s7] ss:$0 sm:$0xff] }
  0x99   : > { %v660_v19 = vpop.permute.xlu0 %659 }
  0x9a   : > { %v360_v20 = vpop.permute.xlu1 %359  ;;  %vm661_vm5 = vcmp.eq.s32.totalorder %v660_v19, %v657_v15 }
  0x9b   : > { %v366_v21 = vmul.f32 %v365_v16, %v360_v20  ;;  %v1106_v22 = vsel %vm661_vm5, 1.0, %v1291_v7  ;;  %v1093_v16 = vld [vmem:[%s1592_s6] ss:$0 sm:$0xff] }
  0x9c   : > { %1143 = vmatmul.mubr.msk.f32.vlgmr.msra.gmra.mrb[0].mxu0 %vm664_vm4, %v1106_v22 }
  0x9d   : > { %v371_v24 = vadd.f32 %v370_v18, %v366_v21 }
  0x9e   : > { %v835_v27 = vpop.permute.xlu0 %834 }
  0x9f   : > { %v467_v28 = vpop.permute.xlu1 %466  ;;  %v372_v29 = vmax.f32 %v371_v24, 0.0  ;;  %vm836_vm6 = vcmp.eq.s32.totalorder %v835_v27, %v657_v15 }
  0xa0   : > { %v473_v30 = vmul.f32 %v472_v23, %v467_v28  ;;  %v1115_v31 = vsel %vm836_vm6, 1.0, %v1291_v7 }
  0xa1   : > { %373 = vadd.xlane.f32.xlu0 %v372_v29  ;;  %1150 = vmatmul.mubr.msk.f32.vlgmr.msra.gmra.mrb[0].mxu1 %vm664_vm4, %v1115_v31 }
  0xa2   : > { %v478_v33 = vadd.f32 %v477_v26, %v473_v30 }
  0xa4   : > { %v561_v35 = vpop.permute.xlu1 %560  ;;  %v479_v36 = vmax.f32 %v478_v33, 0.0 }
  0xa5   : > { %v567_v37 = vmul.f32 %v566_v32, %v561_v35 }
  0xa6   : > { %480 = vadd.xlane.f32.xlu1 %v479_v36 }
  0xa7   : > { %v572_v38 = vadd.f32 %v571_v34, %v567_v37 }
  0xa9   : > { %v573_v39 = vmax.f32 %v572_v38, 0.0 }
  0xab   : > { %574 = vadd.xlane.f32.xlu0 %v573_v39 }
 0x12e   : > { %v374_v40 = vpop.xlane.xlu0 %373 }
 0x12f   : > { %v376_v41 = vmul.f32 0.0078125, %v374_v40 }
 0x131   : > { %v377_v44 = vsub.f32 %v372_v29, %v376_v41 }
 0x133   : > { %v481_v43 = vpop.xlane.xlu1 %480  ;;  %v378_v50 = vmul.f32 %v377_v44, %v377_v44 }
 0x134   : > { %v482_v46 = vmul.f32 0.0078125, %v481_v43 }
 0x136   : > { %v483_v51 = vsub.f32 %v479_v36, %v482_v46 }
 0x138   : > { %v575_v42 = vpop.xlane.xlu0 %574  ;;  %v484_v55 = vmul.f32 %v483_v51, %v483_v51 }
 0x139   : > { %v576_v45 = vmul.f32 0.0078125, %v575_v42 }
 0x13b   : > { %v577_v49 = vsub.f32 %v573_v39, %v576_v45 }
 0x13d   : > { %v578_v54 = vmul.f32 %v577_v49, %v577_v49 }
 0x16f   : > { %v738_v47 = vpop.f32.mrb[0].mxu0 }
 0x170   : > { %v1144_v48 = vpop.f32.mrb[1].mxu0  ;;  %742 = vadd.xlane.f32.xlu0 %v738_v47 }
 0x174   : > { %v908_v52 = vpop.f32.mrb[0].mxu1  ;;  %379 = vadd.xlane.f32.xlu0 %v378_v50 }
 0x175   : > { %v1151_v53 = vpop.f32.mrb[1].mxu1  ;;  %912 = vadd.xlane.f32.xlu1 %v908_v52 }
 0x178   : > { %579 = vadd.xlane.f32.xlu0 %v578_v54 }
 0x179   : > { %485 = vadd.xlane.f32.xlu1 %v484_v55 }
 0x1fd   : > { %v743_v56 = vpop.xlane.xlu0 %742 }
 0x1fe   : > { %v744_v57 = vmul.f32 0.0078125, %v743_v56 }
 0x200   : > { %v1424_v58 = vsub.f32 %v738_v47, %v744_v57 }
 0x201   : > { %v380_v59 = vpop.xlane.xlu0 %379 }
 0x202   : > { %v381_v60 = vmul.f32 0.0078125, %v380_v59  ;;  %v913_v61 = vpop.xlane.xlu1 %912  ;;  %v746_v62 = vmul.f32 %v1424_v58, %v1424_v58 }
 0x203   : > { %v914_v63 = vmul.f32 0.0078125, %v913_v61 }
 0x204   : > { %v382_v0 = vadd.f32 1e-05, %v381_v60  ;;  %747 = vadd.xlane.f32.xlu1 %v746_v62 }
 0x205   : > { %v1428_v1 = vsub.f32 %v908_v52, %v914_v63  ;;  %v580_v2 = vpop.xlane.xlu0 %579 }
 0x206   : > { %1213 = vrsqrt.f32 %v382_v0  ;;  %v581_v3 = vmul.f32 0.0078125, %v580_v2  ;;  %v486_v4 = vpop.xlane.xlu1 %485 }
 0x207   : > { %v487_v5 = vmul.f32 0.0078125, %v486_v4  ;;  %v916_v6 = vmul.f32 %v1428_v1, %v1428_v1 }
 0x208   : > { %v582_v7 = vadd.f32 1e-05, %v581_v3 }
 0x209   : > { %v488_v8 = vadd.f32 1e-05, %v487_v5  ;;  %917 = vadd.xlane.f32.xlu0 %v916_v6 }
 0x20a   : > { %1215 = vrsqrt.f32 %v582_v7 }
 0x20b   : > { %1217 = vrsqrt.f32 %v488_v8 }
 0x210   : > { %v1214_v13 = vpop.eup %1213 }
 0x211   : > { %v384_v15 = vmul.f32 %v1214_v13, %v377_v44 }
 0x213   : > { %v391_v18 = vmul.f32 %v1092_v14, %v384_v15 }
 0x214   : > { %v1216_v19 = vpop.eup %1215 }
 0x215   : > { %v1218_v20 = vpop.eup %1217  ;;  %v398_v21 = vadd.f32 %v1093_v16, %v391_v18  ;;  %v584_v22 = vmul.f32 %v1216_v19, %v577_v49 }
 0x216   : > { %v490_v23 = vmul.f32 %v1218_v20, %v483_v51 }
 0x217   : > { %v400_v24 = vcombine.high %v398_v21, %v398_v21  ;;  %v407_v25 = vrot.slane %v398_v21, %v1439_v17  ;;  %v585_v26 = vmul.f32 %v1092_v14, %v584_v22 }
 0x218   : > { %v491_v27 = vmul.f32 %v1092_v14, %v490_v23  ;;  %v1110_v14 = vld [vmem:[%s1594_s8] ss:$0 sm:$0xff] }
 0x219   : > { %v414_v28 = vrot.slane %v400_v24, %v1439_v17  ;;  %v415_v29 = vcombine.high %v407_v25, %v407_v25  ;;  %v423_v30 = vrot.slane %v407_v25, %v1439_v17  ;;  %1094 = vst.sshfl [vmem:[%s1446_s16] sm:$0x1 pattern:$0x73625140] %v407_v25  ;;  %v586_v11 = vadd.f32 %v1093_v16, %v585_v26 }
 0x21a   : > { %v492_v31 = vadd.f32 %v1093_v16, %v491_v27 }
 0x21b   : > { %v416_v32 = vcombine.high %v414_v28, %v414_v28  ;;  %v430_v33 = vrot.slane %v414_v28, %v1439_v17  ;;  %v437_v34 = vrot.slane %v415_v29, %v1439_v17  ;;  %v445_v35 = vcombine.high %v423_v30, %v423_v30  ;;  %1095 = vst.sshfl [vmem:[%s1446_s16 + $0x8] sm:$0x1 pattern:$0x73625140] %v415_v29 }
 0x21c   : > { %1096 = vst.sshfl [vmem:[%s1446_s16 + $0x20] sm:$0x1 pattern:$0x73625140] %v414_v28  ;;  %v588_v36 = vcombine.high %v586_v11, %v586_v11  ;;  %v595_v37 = vrot.slane %v586_v11, %v1439_v17  ;;  %v494_v38 = vcombine.high %v492_v31, %v492_v31  ;;  %v501_v39 = vrot.slane %v492_v31, %v1439_v17 }
 0x21d   : > { %v444_v40 = vrot.slane %v416_v32, %v1439_v17  ;;  %v446_v41 = vcombine.high %v430_v33, %v430_v33  ;;  %v447_v42 = vcombine.high %v437_v34, %v437_v34  ;;  %459 = vst [vmem:[%s1446_s16 + $0x10] sm:$0x1] %v445_v35  ;;  %1097 = vst.sshfl [vmem:[%s1446_s16 + $0x28] sm:$0x1 pattern:$0x73625140] %v416_v32 }
 0x21e   : > { %v602_v43 = vrot.slane %v588_v36, %v1439_v17  ;;  %v603_v44 = vcombine.high %v595_v37, %v595_v37  ;;  %v611_v45 = vrot.slane %v595_v37, %v1439_v17  ;;  %1102 = vst.sshfl [vmem:[%s1446_s16 + $0x2] sm:$0x1 pattern:$0x73625140] %v595_v37  ;;  %v508_v46 = vrot.slane %v494_v38, %v1439_v17 }
 0x21f   : > { %1098 = vst.sshfl [vmem:[%s1446_s16 + $0x1] sm:$0x1 pattern:$0x73625140] %v501_v39  ;;  %v448_v47 = vcombine.high %v444_v40, %v444_v40  ;;  %460 = vst [vmem:[%s1446_s16 + $0x18] sm:$0x1] %v447_v42  ;;  %v509_v48 = vcombine.high %v501_v39, %v501_v39  ;;  %v517_v49 = vrot.slane %v501_v39, %v1439_v17 }
 0x220   : > { %463 = vst [vmem:[%s1446_s16 + $0x30] sm:$0x1] %v446_v41  ;;  %v604_v50 = vcombine.high %v602_v43, %v602_v43  ;;  %v618_v51 = vrot.slane %v602_v43, %v1439_v17  ;;  %v625_v52 = vrot.slane %v603_v44, %v1439_v17  ;;  %v633_v53 = vcombine.high %v611_v45, %v611_v45 }
 0x221   : > { %1103 = vst.sshfl [vmem:[%s1446_s16 + $0xa] sm:$0x1 pattern:$0x73625140] %v603_v44  ;;  %464 = vst [vmem:[%s1446_s16 + $0x38] sm:$0x1] %v448_v47  ;;  %v510_v54 = vcombine.high %v508_v46, %v508_v46  ;;  %v524_v55 = vrot.slane %v508_v46, %v1439_v17  ;;  %v531_v56 = vrot.slane %v509_v48, %v1439_v17 }
 0x222   : > { %1104 = vst.sshfl [vmem:[%s1446_s16 + $0x22] sm:$0x1 pattern:$0x73625140] %v602_v43  ;;  %v539_v57 = vcombine.high %v517_v49, %v517_v49  ;;  %v632_v59 = vrot.slane %v604_v50, %v1439_v17  ;;  %v634_v60 = vcombine.high %v618_v51, %v618_v51  ;;  %v635_v61 = vcombine.high %v625_v52, %v625_v52 }
 0x223   : > { %1100 = vst.sshfl [vmem:[%s1446_s16 + $0x21] sm:$0x1 pattern:$0x73625140] %v508_v46  ;;  %647 = vst [vmem:[%s1446_s16 + $0x12] sm:$0x1] %v633_v53  ;;  %v538_v62 = vrot.slane %v510_v54, %v1439_v17  ;;  %v540_v63 = vcombine.high %v524_v55, %v524_v55  ;;  %v541_v0 = vcombine.high %v531_v56, %v531_v56 }
 0x224   : > { %1099 = vst.sshfl [vmem:[%s1446_s16 + $0x9] sm:$0x1 pattern:$0x73625140] %v509_v48  ;;  %553 = vst [vmem:[%s1446_s16 + $0x11] sm:$0x1] %v539_v57  ;;  %v636_v2 = vcombine.high %v632_v59, %v632_v59 }
 0x225   : > { %1105 = vst.sshfl [vmem:[%s1446_s16 + $0x2a] sm:$0x1 pattern:$0x73625140] %v604_v50  ;;  %648 = vst [vmem:[%s1446_s16 + $0x1a] sm:$0x1] %v635_v61  ;;  %v542_v3 = vcombine.high %v538_v62, %v538_v62 }
 0x226   : > { %1101 = vst.sshfl [vmem:[%s1446_s16 + $0x29] sm:$0x1 pattern:$0x73625140] %v510_v54  ;;  %651 = vst [vmem:[%s1446_s16 + $0x32] sm:$0x1] %v634_v60 }
 0x227   : > { %554 = vst [vmem:[%s1446_s16 + $0x19] sm:$0x1] %v541_v0  ;;  %557 = vst [vmem:[%s1446_s16 + $0x31] sm:$0x1] %v540_v63 }
 0x228   : > { %652 = vst [vmem:[%s1446_s16 + $0x3a] sm:$0x1] %v636_v2  ;;  %558 = vst [vmem:[%s1446_s16 + $0x39] sm:$0x1] %v542_v3 }
 0x291   : > { %v748_v4 = vpop.xlane.xlu1 %747 }
 0x292   : > { %v749_v5 = vmul.f32 0.0078125, %v748_v4 }
 0x294   : > { %v750_v6 = vadd.f32 1e-05, %v749_v5 }
 0x296   : > { %1219 = vrsqrt.f32 %v750_v6  ;;  %v918_v7 = vpop.xlane.xlu0 %917 }
 0x297   : > { %v919_v8 = vmul.f32 0.0078125, %v918_v7 }
 0x299   : > { %v920_v9 = vadd.f32 1e-05, %v919_v8 }
 0x29b   : > { %1221 = vrsqrt.f32 %v920_v9 }
 0x2a0   : > { %v1220_v10 = vpop.eup %1219 }
 0x2a1   : > { %v752_v13 = vmul.f32 %v1220_v10, %v1424_v58 }
 0x2a3   : > { %v759_v15 = vmul.f32 %v1109_v12, %v752_v13 }
 0x2a5   : > { %v1222_v16 = vpop.eup %1221  ;;  %v766_v18 = vadd.f32 %v1110_v14, %v759_v15 }
 0x2a6   : > { %v922_v19 = vmul.f32 %v1222_v16, %v1428_v1 }
 0x2a7   : > { %v768_v20 = vcombine.high %v766_v18, %v766_v18  ;;  %v775_v21 = vrot.slane %v766_v18, %v1439_v17 }
 0x2a8   : > { %v923_v22 = vmul.f32 %v1109_v12, %v922_v19 }
 0x2a9   : > { %v782_v23 = vrot.slane %v768_v20, %v1439_v17  ;;  %v783_v24 = vcombine.high %v775_v21, %v775_v21  ;;  %v791_v58 = vrot.slane %v775_v21, %v1439_v17  ;;  %1111 = vst.sshfl [vmem:[%s1446_s16 + $0x3] sm:$0x1 pattern:$0x73625140] %v775_v21 }
 0x2aa   : > { %v924_v25 = vadd.f32 %v1110_v14, %v923_v22 }
 0x2ab   : > { %v784_v26 = vcombine.high %v782_v23, %v782_v23  ;;  %v798_v27 = vrot.slane %v782_v23, %v1439_v17  ;;  %v805_v28 = vrot.slane %v783_v24, %v1439_v17  ;;  %v813_v1 = vcombine.high %v791_v58, %v791_v58  ;;  %1112 = vst.sshfl [vmem:[%s1446_s16 + $0xb] sm:$0x1 pattern:$0x73625140] %v783_v24 }
 0x2ac   : > { %1113 = vst.sshfl [vmem:[%s1446_s16 + $0x23] sm:$0x1 pattern:$0x73625140] %v782_v23  ;;  %v926_v29 = vcombine.high %v924_v25, %v924_v25  ;;  %v933_v30 = vrot.slane %v924_v25, %v1439_v17 }
 0x2ad   : > { %v812_v11 = vrot.slane %v784_v26, %v1439_v17  ;;  %v814_v31 = vcombine.high %v798_v27, %v798_v27  ;;  %v815_v32 = vcombine.high %v805_v28, %v805_v28  ;;  %827 = vst [vmem:[%s1446_s16 + $0x13] sm:$0x1] %v813_v1  ;;  %1114 = vst.sshfl [vmem:[%s1446_s16 + $0x2b] sm:$0x1 pattern:$0x73625140] %v784_v26 }
 0x2ae   : > { %v940_v33 = vrot.slane %v926_v29, %v1439_v17  ;;  %v941_v34 = vcombine.high %v933_v30, %v933_v30  ;;  %v949_v35 = vrot.slane %v933_v30, %v1439_v17  ;;  %1118 = vst.sshfl [vmem:[%s1446_s16 + $0x4] sm:$0x1 pattern:$0x73625140] %v933_v30 }
 0x2af   : > { %v816_v36 = vcombine.high %v812_v11, %v812_v11  ;;  %828 = vst [vmem:[%s1446_s16 + $0x1b] sm:$0x1] %v815_v32  ;;  %831 = vst [vmem:[%s1446_s16 + $0x33] sm:$0x1] %v814_v31 }
 0x2b0   : > { %v942_v37 = vcombine.high %v940_v33, %v940_v33  ;;  %v956_v38 = vrot.slane %v940_v33, %v1439_v17  ;;  %v963_v39 = vrot.slane %v941_v34, %v1439_v17  ;;  %v971_v40 = vcombine.high %v949_v35, %v949_v35  ;;  %1119 = vst.sshfl [vmem:[%s1446_s16 + $0xc] sm:$0x1 pattern:$0x73625140] %v941_v34  ;;  %998 = sbr.rel (!%p1386_p5) target bundleno = 723 (0x2d3), region = 60 }
 0x2b1   : > { %1120 = vst.sshfl [vmem:[%s1446_s16 + $0x24] sm:$0x1 pattern:$0x73625140] %v940_v33  ;;  %832 = vst [vmem:[%s1446_s16 + $0x3b] sm:$0x1] %v816_v36 }
 0x2b2   : > { %v970_v41 = vrot.slane %v942_v37, %v1439_v17  ;;  %v972_v42 = vcombine.high %v956_v38, %v956_v38  ;;  %v973_v43 = vcombine.high %v963_v39, %v963_v39  ;;  %985 = vst [vmem:[%s1446_s16 + $0x14] sm:$0x1] %v971_v40  ;;  %1121 = vst.sshfl [vmem:[%s1446_s16 + $0x2c] sm:$0x1 pattern:$0x73625140] %v942_v37 }
 0x2b4   : > { %v974_v44 = vcombine.high %v970_v41, %v970_v41  ;;  %986 = vst [vmem:[%s1446_s16 + $0x1c] sm:$0x1] %v973_v43  ;;  %989 = vst [vmem:[%s1446_s16 + $0x34] sm:$0x1] %v972_v42 }
 0x2b6   : > { %990 = vst [vmem:[%s1446_s16 + $0x3c] sm:$0x1] %v974_v44 }
 0x2b7   : > { %s1603_s27 = smov (!%p1001_p11, %s1000_s27), 8 }
 0x2b8   : > { %s1530_s28 = sshll.u32 %s1603_s27, 7 }
 0x2b9   : > { %s1005_s29 = ssub.s32 1024, %s1530_s28 }
 0x2ba   : > { %1006 = vsyncadd %s1525_s24, %s1005_s29  ;;  %p1125_p12 = scmp.ne.s32.totalorder %s1530_s28, 0  ;;  %s1131_s25 = sshll.u32 %s1369_s13, 10 }
 0x2bb   : > { %s1539_s17 = scalar_lea.hbm %s1595_s9, %s1131_s25  ;;  %s1011_s21 = sshll.u32 %s1446_s16, 4  ;;  %s1542_s21 = int_to_ptr.vmem [resolvable:$true] %s1011_s21 }
 0x2bc   : > { %s1223_s22 = scalar_lea.vmem %s1542_s21, %s1530_s28  ;;  %s1295_s23 = smov [#allocation2]  }
 0x2bd   : > { %p1224_p13 = scmp.ne.s32.totalorder %s1542_s21, %s1223_s22  ;;  %s1227_s26 = sshll.u32 %s1295_s23, 4  ;;  %s1228_s26 = int_to_ptr.vmem [resolvable:$false] %s1227_s26 }
 0x2be   : > { %s1229_s13 = scalar_lea.vmem %s1228_s26, 2048  ;;  %p1230_p2 = scmp.lt.s32.totalorder %s1542_s21, %s1228_s26 }
 0x2bf   : > { %p1225_p0 = pnand %p1224_p13, %p1125_p12  ;;  %p1231_p3 = scmp.lt.s32.totalorder %s1229_s13, %s1223_s22 }
 0x2c1   : > { %p1226_p1 = pneg %p1225_p0  ;;  %p1232_p4 = por %p1231_p3, %p1230_p2 }
 0x2c3   : > { %p1233_p5 = pnand %p1232_p4, %p1226_p1 }
 0x2c5   : > { %1236 = shalt.err (!%p1233_p5)
}
 0x2c6   : > { %s1237_s16 = scalar_lea.hbm %s1539_s17, %s1530_s28  ;;  %s1241_s25 = scalar_lea.hbm %s1595_s9, 1280 }
 0x2c7   : > { %p1238_p7 = scmp.ne.s32.totalorder %s1539_s17, %s1237_s16  ;;  %p1242_p10 = scmp.lt.u32.totalorder %s1539_s17, %s1595_s9 }
 0x2c8   : > { %p1243_p11 = scmp.lt.u32.totalorder %s1241_s25, %s1237_s16  ;;  %p1245_p0 = scmp.lt.u32.totalorder %s1237_s16, %s1539_s17 }
 0x2c9   : > { %p1239_p8 = pnand %p1238_p7, %p1125_p12 }
 0x2ca   : > { %p1244_p13 = por %p1243_p11, %p1242_p10 }
 0x2cb   : > { %p1240_p9 = pneg %p1239_p8 }
 0x2cc   : > { %p1246_p1 = por %p1245_p0, %p1244_p13 }
 0x2ce   : > { %p1247_p2 = pnand %p1246_p1, %p1240_p9 }
 0x2d0   : > { %1250 = shalt.err (!%p1247_p2)
}
 0x2d1   : > { %s1296_s22 = smov 128   ;;  %s1297_s23 = smov 8  }
 0x2d2   : > { %1017 = dma.vmem_to_hbm [thread:$0]  (%p1125_p12), %s1542_s21, %s1530_s28, %s1539_s17, %s1525_s24, %s1296_s22, %s1296_s22, %s1297_s23  }
 0x2d3 PF: > { %p1165_p3 = scmp.ge.s32.totalorder %s1285_s12, 2  ;;  %s1026_s26 = sand.u32 1, %s1273_s30  }
 0x2d4   : > { %s1027_s13 = scalar_lea.sflag [#allocation3], %s1026_s26 }
 0x2d5   : > { %p1162_p4 = pnand %p1165_p3, %p1390_p6 }
 0x2d7   : > { %1268 = dma.done.wait (!%p1162_p4), %s1027_s13, 1024  }
 0x2d8   : > { %1270 = vsyncadd (!%p1162_p4), %s1027_s13, 4294966272  ;;  %p19_p5 = scmp.ge.s32.totalorder %s1373_s15, 4   ;;  %s1598_s30 = smov %s1277_s10 }
 0x2d9   : > { %s1599_s10 = smov %s1281_s11  ;;  %s1600_s11 = smov %s1384_s18 }
 0x2da   : > { %s1601_s12 = smov %s1373_s15  ;;  %21 = sbr.rel (!%p19_p5) target bundleno = 3 (0x3), region = 94 }
 0x2e1   :  { %1032 = vsyncpa [#allocation3], 1 }
 0x2e2   :  { %1034 = vsyncpa [#allocation3 + $0x1], 1 }

</bundles_post_ra>
